<compile_context>
chip_gen: v5e
topology: v5e:2x2
jax: 0.10.0
libtpu: 0.0.40
codegen_flags: <defaults>
</compile_context>

<pallas_src>
import functools

import jax
import jax.numpy as jnp
import numpy as np
from jax.experimental import pallas as pl
from jax.experimental.pallas import tpu as pltpu


def _round_up(x, m):
    return (x + m - 1) // m * m


def leaky_kernel(x_ref, o_ref, *, alpha):
    # x_ref / o_ref: (block_rows, lane_w) lane-dense VMEM tiles.
    x = x_ref[...]
    a = jnp.asarray(alpha, dtype=x.dtype)
    o_ref[...] = jnp.where(x < 0.0, x * a, x)


def leaky(x, alpha=0.02):
    """Elementwise leaky activation matching Leaky.forward (any shape/dtype)."""
    orig_shape = x.shape
    orig_dtype = x.dtype
    flat = x.reshape(-1)
    n = flat.shape[0]

    LANE = 128
    # Lane width: big multiple of 128 (lane-dense stores), but not larger than the
    # (padded) problem so tiny inputs don't blow up.
    lane_w = min(4096, _round_up(n, LANE))
    lane_w = max(LANE, (lane_w // LANE) * LANE)

    rows = _round_up(n, lane_w) // lane_w

    # Rows per block: multiple of 8 (sublane tiling), capped so one buffer is
    # ~2 MiB -> with double-buffered input+output that's ~8 MiB of VMEM, safe on
    # v5e/v6e (128 MiB) and v7x (64 MiB) scoped defaults.
    bytes_per_elem = jnp.dtype(orig_dtype).itemsize
    max_rows = max(8, ((2 * 1024 * 1024) // (lane_w * bytes_per_elem)) // 8 * 8)
    block_rows = min(_round_up(rows, 8), max_rows)
    rows_pad = _round_up(rows, block_rows)

    total = rows_pad * lane_w
    if total != n:
        flat = jnp.pad(flat, (0, total - n))
    x2d = flat.reshape(rows_pad, lane_w)

    grid = (rows_pad // block_rows,)
    out2d = pl.pallas_call(
        functools.partial(leaky_kernel, alpha=alpha),
        out_shape=jax.ShapeDtypeStruct((rows_pad, lane_w), orig_dtype),
        grid_spec=pltpu.PrefetchScalarGridSpec(
            num_scalar_prefetch=0,
            grid=grid,
            in_specs=[pl.BlockSpec((block_rows, lane_w), lambda i: (i, 0))],
            out_specs=pl.BlockSpec((block_rows, lane_w), lambda i: (i, 0)),
        ),
        compiler_params=pltpu.CompilerParams(dimension_semantics=("parallel",)),
    )(x2d)

    return out2d.reshape(-1)[:n].reshape(orig_shape)


def _reference(x, alpha=0.02):
    """Pure-JAX reference matching torch.where(x < 0.0, x * alpha, x)."""
    return jnp.where(x < 0.0, x * alpha, x)


if __name__ == "__main__":
    B, C, H, W = 2, 4, 16, 16
    key = jax.random.PRNGKey(0)
    x = jax.random.normal(key, (B, C, H, W), dtype=jnp.float32)

    out = leaky(x, alpha=0.02)
    out = jax.block_until_ready(out)

    ref = jax.block_until_ready(_reference(x, alpha=0.02))
    np.testing.assert_allclose(np.asarray(out), np.asarray(ref), atol=0.0, rtol=0.0)

    print("KERNEL_OK")
</pallas_src>

<mosaic_0001>
module attributes {stable_mosaic.version = 11 : i64} {
  func.func @leaky_kernel(%arg0: i32, %arg1: memref<8x2048xf32, #tpu.memory_space<vmem>>, %arg2: memref<8x2048xf32, #tpu.memory_space<vmem>>) attributes {dimension_semantics = [#tpu.dimension_semantics<parallel>], iteration_bounds = array<i64: 1>, scalar_prefetch = 0 : i64, scratch_operands = 0 : i64, tpu.core_type = #tpu.core_type<tc>, window_params = [{transform_indices = @transform_0, window_bounds = array<i64: 8, 2048>}, {transform_indices = @transform_1, window_bounds = array<i64: 8, 2048>}]} {
    %c0 = arith.constant 0 : index
    %c0_0 = arith.constant 0 : index
    %0 = vector.load %arg1[%c0, %c0_0] : memref<8x2048xf32, #tpu.memory_space<vmem>>, vector<8x2048xf32>
    %cst = arith.constant 0.000000e+00 : f32
    %1 = vector.broadcast %cst : f32 to vector<8x2048xf32>
    %2 = arith.cmpf olt, %0, %1 : vector<8x2048xf32>
    %cst_1 = arith.constant 2.000000e-02 : f32
    %3 = vector.broadcast %cst_1 : f32 to vector<8x2048xf32>
    %4 = arith.mulf %0, %3 : vector<8x2048xf32>
    %5 = arith.select %2, %4, %0 : vector<8x2048xi1>, vector<8x2048xf32>
    %c0_2 = arith.constant 0 : index
    %c0_3 = arith.constant 0 : index
    %6 = vector.load %arg2[%c0_2, %c0_3] : memref<8x2048xf32, #tpu.memory_space<vmem>>, vector<8x2048xf32>
    tpu.vector_store %arg2[%c0_2, %c0_3], %5 {strides = array<i32>} : memref<8x2048xf32, #tpu.memory_space<vmem>>, vector<8x2048xf32>,
    return
  }
  func.func @transform_0(%arg0: i32) -> (i32, i32) {
    %c0_i32 = arith.constant 0 : i32
    %c0_i32_0 = arith.constant 0 : i32
    return %arg0, %c0_i32 : i32, i32
  }
  func.func @transform_1(%arg0: i32) -> (i32, i32) {
    %c0_i32 = arith.constant 0 : i32
    %c0_i32_0 = arith.constant 0 : i32
    return %arg0, %c0_i32 : i32, i32
  }
}

</mosaic_0001>

<bundles_post_ra>
// kernel: tpu_custom_call.1
= control target key start
LH: loop header
LB: loop body
LE: loop exit
PB: predicated region body
PF: predicated region fallthrough
CT: control target
= control target key end

     0   :  { %6 = vsyncpa [#allocation3], 0  ;;  %s192_s0 = inlined_call_operand.hbm [shape: f32[8,2048], index: 0, kind: input, shape index: {}]   ;;  %s193_s1 = inlined_call_operand.hbm [shape: f32[8,2048], index: 1, kind: output, shape index: {}]  }
   0x1   :  { %7 = vsyncpa [#allocation4], 0  ;;  %s13_s8 = sshll.u32 %s192_s0, 4  ;;  %s174_s9 = smov [#allocation2]   ;;  %s14_s8 = int_to_ptr.hbm [resolvable:$true] %s13_s8 }
   0x2   :  { %s15_s10 = sshll.u32 %s174_s9, 4  ;;  %s16_s10 = int_to_ptr.vmem [resolvable:$true] %s15_s10 }
   0x3   :  { %18 = dma.hbm_to_vmem [thread:$0]  %s14_s8, 2048, %s16_s10, [#allocation3]  }
   0x4   :  { %170 = dma.done.wait [#allocation3], 2048  }
   0x5   :  { %171 = vsyncadd [#allocation3], 4294965248  ;;  %v23_v0 = vld [vmem:[#allocation2] sm:$0xff]  ;;  %v24_v1 = vld [vmem:[#allocation2 + $0x8] sm:$0xff]  ;;  %s175_s0 = smov [#allocation5]   ;;  %s110_s14 = sshll.u32 %s193_s1, 4  ;;  %s111_s14 = int_to_ptr.hbm [resolvable:$true] %s110_s14 }
   0x6   :  { %v25_v2 = vld [vmem:[#allocation2 + $0x10] sm:$0xff]  ;;  %vm39_vm0 = vcmp.lt.f32.partialorder %v23_v0, 0.0  ;;  %v55_v3 = vmul.f32 0.02, %v23_v0  ;;  %vm40_vm1 = vcmp.lt.f32.partialorder %v24_v1, 0.0  ;;  %v26_v6 = vld [vmem:[#allocation2 + $0x18] sm:$0xff] }
   0x7   :  { %v56_v4 = vmul.f32 0.02, %v24_v1  ;;  %vm41_vm2 = vcmp.lt.f32.partialorder %v25_v2, 0.0  ;;  %v57_v5 = vmul.f32 0.02, %v25_v2  ;;  %v27_v7 = vld [vmem:[#allocation2 + $0x20] sm:$0xff] }
   0x8   :  { %v28_v8 = vld [vmem:[#allocation2 + $0x28] sm:$0xff]  ;;  %v71_v9 = vsel %vm39_vm0, %v55_v3, %v23_v0  ;;  %vm42_vm3 = vcmp.lt.f32.partialorder %v26_v6, 0.0  ;;  %v58_v11 = vmul.f32 0.02, %v26_v6  ;;  %v29_v12 = vld [vmem:[#allocation2 + $0x30] sm:$0xff]  ;;  %v30_v13 = vld [vmem:[#allocation2 + $0x38] sm:$0xff] }
   0x9   :  { %v72_v10 = vsel %vm40_vm1, %v56_v4, %v24_v1  ;;  %v31_v14 = vld [vmem:[#allocation2 + $0x40] sm:$0xff]  ;;  %87 = vst [vmem:[#allocation5] sm:$0xff] %v71_v9  ;;  %v73_v15 = vsel %vm41_vm2, %v57_v5, %v25_v2  ;;  %vm43_vm4 = vcmp.lt.f32.partialorder %v27_v7, 0.0  ;;  %v59_v16 = vmul.f32 0.02, %v27_v7  ;;  %v32_v17 = vld [vmem:[#allocation2 + $0x48] sm:$0xff] }
   0xa   :  { %vm44_vm5 = vcmp.lt.f32.partialorder %v28_v8, 0.0  ;;  %88 = vst [vmem:[#allocation5 + $0x8] sm:$0xff] %v72_v10  ;;  %v74_v18 = vsel %vm42_vm3, %v58_v11, %v26_v6  ;;  %v60_v19 = vmul.f32 0.02, %v28_v8  ;;  %vm45_vm6 = vcmp.lt.f32.partialorder %v29_v12, 0.0  ;;  %v33_v23 = vld [vmem:[#allocation2 + $0x50] sm:$0xff] }
   0xb   :  { %v61_v20 = vmul.f32 0.02, %v29_v12  ;;  %89 = vst [vmem:[#allocation5 + $0x10] sm:$0xff] %v73_v15  ;;  %v75_v21 = vsel %vm43_vm4, %v59_v16, %v27_v7  ;;  %vm46_vm7 = vcmp.lt.f32.partialorder %v30_v13, 0.0  ;;  %v62_v22 = vmul.f32 0.02, %v30_v13 }
   0xc   :  { %vm47_vm8 = vcmp.lt.f32.partialorder %v31_v14, 0.0  ;;  %90 = vst [vmem:[#allocation5 + $0x18] sm:$0xff] %v74_v18  ;;  %v76_v24 = vsel %vm44_vm5, %v60_v19, %v28_v8  ;;  %v63_v26 = vmul.f32 0.02, %v31_v14  ;;  %vm48_vm9 = vcmp.lt.f32.partialorder %v32_v17, 0.0  ;;  %v34_v27 = vld [vmem:[#allocation2 + $0x58] sm:$0xff] }
   0xd   :  { %v77_v25 = vsel %vm45_vm6, %v61_v20, %v29_v12  ;;  %v35_v28 = vld [vmem:[#allocation2 + $0x60] sm:$0xff]  ;;  %91 = vst [vmem:[#allocation5 + $0x20] sm:$0xff] %v75_v21  ;;  %v78_v29 = vsel %vm46_vm7, %v62_v22, %v30_v13  ;;  %v64_v30 = vmul.f32 0.02, %v32_v17  ;;  %vm49_vm10 = vcmp.lt.f32.partialorder %v33_v23, 0.0  ;;  %v36_v34 = vld [vmem:[#allocation2 + $0x68] sm:$0xff] }
   0xe   :  { %v65_v31 = vmul.f32 0.02, %v33_v23  ;;  %92 = vst [vmem:[#allocation5 + $0x28] sm:$0xff] %v76_v24  ;;  %v79_v32 = vsel %vm47_vm8, %v63_v26, %v31_v14  ;;  %vm50_vm11 = vcmp.lt.f32.partialorder %v34_v27, 0.0  ;;  %v66_v33 = vmul.f32 0.02, %v34_v27 }
   0xf   :  { %93 = vst [vmem:[#allocation5 + $0x30] sm:$0xff] %v77_v25  ;;  %v80_v35 = vsel %vm48_vm9, %v64_v30, %v32_v17  ;;  %vm51_vm12 = vcmp.lt.f32.partialorder %v35_v28, 0.0  ;;  %v67_v36 = vmul.f32 0.02, %v35_v28  ;;  %v37_v37 = vld [vmem:[#allocation2 + $0x70] sm:$0xff]  ;;  %v38_v38 = vld [vmem:[#allocation2 + $0x78] sm:$0xff] }
  0x10   :  { %94 = vst [vmem:[#allocation5 + $0x38] sm:$0xff] %v78_v29  ;;  %v81_v39 = vsel %vm49_vm10, %v65_v31, %v33_v23  ;;  %vm52_vm13 = vcmp.lt.f32.partialorder %v36_v34, 0.0  ;;  %v68_v40 = vmul.f32 0.02, %v36_v34  ;;  %v69_v41 = vmul.f32 0.02, %v37_v37 }
  0x11   :  { %95 = vst [vmem:[#allocation5 + $0x40] sm:$0xff] %v79_v32  ;;  %v82_v42 = vsel %vm50_vm11, %v66_v33, %v34_v27  ;;  %vm53_vm14 = vcmp.lt.f32.partialorder %v37_v37, 0.0  ;;  %v70_v43 = vmul.f32 0.02, %v38_v38  ;;  %v83_v44 = vsel %vm51_vm12, %v67_v36, %v35_v28  ;;  %s108_s11 = sshll.u32 %s175_s0, 4  ;;  %s109_s11 = int_to_ptr.vmem [resolvable:$true] %s108_s11 }
  0x12   :  { %96 = vst [vmem:[#allocation5 + $0x48] sm:$0xff] %v80_v35  ;;  %vm54_vm15 = vcmp.lt.f32.partialorder %v38_v38, 0.0  ;;  %v84_v45 = vsel %vm52_vm13, %v68_v40, %v36_v34  ;;  %v85_v46 = vsel %vm53_vm14, %v69_v41, %v37_v37 }
  0x13   :  { %97 = vst [vmem:[#allocation5 + $0x50] sm:$0xff] %v81_v39  ;;  %v86_v47 = vsel %vm54_vm15, %v70_v43, %v38_v38 }
  0x14   :  { %98 = vst [vmem:[#allocation5 + $0x58] sm:$0xff] %v82_v42 }
  0x15   :  { %99 = vst [vmem:[#allocation5 + $0x60] sm:$0xff] %v83_v44 }
  0x16   :  { %100 = vst [vmem:[#allocation5 + $0x68] sm:$0xff] %v84_v45 }
  0x17   :  { %101 = vst [vmem:[#allocation5 + $0x70] sm:$0xff] %v85_v46 }
  0x18   :  { %102 = vst [vmem:[#allocation5 + $0x78] sm:$0xff] %v86_v47 }
  0x19   :  { %113 = dma.vmem_to_hbm [thread:$0]  %s109_s11, 2048, %s111_s14, [#allocation4]  }
  0x1a   :  { %172 = dma.done.wait [#allocation4], 2048  }
  0x1b   :  { %173 = vsyncadd [#allocation4], 4294965248 }
  0x1c   :  { %118 = vsyncpa [#allocation3], 1 }
  0x1d   :  { %119 = vsyncpa [#allocation4], 1 }

</bundles_post_ra>
